<compile_context>
chip_gen: v7x
topology: tpu7x:2x2x1
jax: 0.10.0
libtpu: 0.0.40
codegen_flags: <defaults>
</compile_context>

<pallas_src>
import functools

import jax
import jax.numpy as jnp
from jax.experimental import pallas as pl
from jax.experimental.pallas import tpu as pltpu

_BN_EPS = 1e-5


def _round_up(x, m):
    return (x + m - 1) // m * m


def _vmem_capacity_bytes():
    """Physical VMEM capacity, with a conservative fallback (v7x per-TC)."""
    try:
        info = pltpu.get_tpu_info()
        cap = getattr(info, "vmem_capacity_bytes", None)
        if cap:
            return int(cap)
    except Exception:
        pass
    return 64 * 1024 * 1024


def _choose_hw_tiling(hw, c_half, cout, out_bytes):
    """Pick the spatial tile (multiple of 128), padded HW and a vmem limit."""
    cap = _vmem_capacity_bytes()
    block_budget = max(8 << 20, min(cap // 2, 48 << 20))
    # Double-buffered bytes per lane column, worst of the two phases:
    #   phase 1: 2 fp32 x inputs + bf16 feat output
    #   phase 2: bf16 feat input + out_dtype output
    per_t = max(2 * 2 * c_half * 4 + 2 * cout * 2,
                2 * cout * 2 + 2 * cout * out_bytes)
    max_t = max(128, min(4096, (block_budget // per_t) // 128 * 128))
    t = min(max_t, _round_up(hw, 128))
    hw_p = _round_up(hw, t)
    vmem_limit = int(min(cap - (8 << 20), per_t * t + (16 << 20)))
    return t, hw_p, vmem_limit


def _fold_bn_split(params, c_half):
    """Fold eval-mode BN scale into the 1x1 conv weight; split along Cin.

    Returns (w_sp, w_cp) in bf16 with shape (Cout, C_half) each, and the
    folded BN bias as an fp32 (Cout, 1) column.
    """
    scale = params["gamma"] / jnp.sqrt(params["rvar"] + _BN_EPS)      # (Cout,)
    bias = params["beta"] - params["rmean"] * scale                   # (Cout,)
    w = params["w1"] * scale[:, None]                                 # (Cout, Cin)
    w_sp = w[:, :c_half].astype(jnp.bfloat16)
    w_cp = w[:, c_half:].astype(jnp.bfloat16)
    return w_sp, w_cp, bias.reshape(-1, 1).astype(jnp.float32)


def _ffm_feat_kernel(xsp_ref, xcp_ref, wsp_ref, wcp_ref, bias_ref,
                     feat_ref, psum_ref):
    """Phase 1: feat = relu(W'@[xsp;xcp] + b) (bf16 store) + per-tile GAP sums.

    Blocks: xsp/xcp (1, C_half, T) fp32   w* (Cout, C_half) bf16
            bias (Cout, 1) fp32           feat (1, Cout, T) bf16
            psum (1, 1, Cout, 1) fp32
    """
    xs = xsp_ref[0].astype(jnp.bfloat16)         # in-kernel cast (VPU, free)
    xc = xcp_ref[0].astype(jnp.bfloat16)
    # Channel concat == sum of two partial matmuls (bf16 in, fp32 accumulate).
    f = jnp.dot(wsp_ref[...], xs, preferred_element_type=jnp.float32)
    f = f + jnp.dot(wcp_ref[...], xc, preferred_element_type=jnp.float32)
    f = jnp.maximum(f + bias_ref[...], 0.0)                          # (Cout, T)
    feat_ref[0] = f.astype(feat_ref.dtype)                           # bf16 store
    psum_ref[0, 0] = jnp.sum(f, axis=1, keepdims=True)               # (Cout, 1)


def _ffm_apply_kernel(feat_ref, scale_ref, o_ref):
    """Phase 2: out = feat * (1 + atten); scale = 1 + atten precomputed."""
    o_ref[0] = (feat_ref[0].astype(jnp.float32) * scale_ref[0]).astype(o_ref.dtype)


def feature_fusion_module(fsp, fcp, params, hw_tile=None, out_dtype=jnp.float32):
    """fsp, fcp: NCHW float32 with identical shapes.  Returns NCHW out_dtype."""
    N, c_half, H, W = fsp.shape
    assert fcp.shape == fsp.shape
    HW = H * W
    cout = params["w1"].shape[0]

    out_bytes = jnp.dtype(out_dtype).itemsize
    if hw_tile is None:
        t_hw, hw_p, vmem_limit = _choose_hw_tiling(HW, c_half, cout, out_bytes)
    else:
        assert hw_tile % 128 == 0
        t_hw = hw_tile
        hw_p = _round_up(HW, t_hw)
        vmem_limit = 32 * 1024 * 1024
    n_hw = hw_p // t_hw
    pad = hw_p - HW

    # NCHW-native (N, C, HW) views (free reshapes, no transpose, fp32 kept).
    xsp = fsp.reshape(N, c_half, HW)
    xcp = fcp.reshape(N, c_half, HW)
    if pad:
        xsp = jnp.pad(xsp, ((0, 0), (0, 0), (0, pad)))
        xcp = jnp.pad(xcp, ((0, 0), (0, 0), (0, pad)))

    w_sp, w_cp, bias = _fold_bn_split(params, c_half)

    cost1 = pl.CostEstimate(
        flops=2 * N * hw_p * (2 * c_half) * cout,
        transcendentals=0,
        bytes_accessed=(2 * N * c_half * hw_p * 4      # x fp32 reads
                        + N * cout * hw_p * 2          # feat bf16 write
                        + N * n_hw * cout * 4          # GAP partial sums
                        + 2 * cout * c_half * 2 + cout * 4),
    )

    feat, psums = pl.pallas_call(
        _ffm_feat_kernel,
        out_shape=(
            jax.ShapeDtypeStruct((N, cout, hw_p), jnp.bfloat16),
            jax.ShapeDtypeStruct((N, n_hw, cout, 1), jnp.float32),
        ),
        grid_spec=pltpu.PrefetchScalarGridSpec(
            num_scalar_prefetch=0,
            grid=(N, n_hw),
            in_specs=[
                pl.BlockSpec((1, c_half, t_hw), lambda b, t: (b, 0, t)),
                pl.BlockSpec((1, c_half, t_hw), lambda b, t: (b, 0, t)),
                pl.BlockSpec((cout, c_half), lambda b, t: (0, 0)),
                pl.BlockSpec((cout, c_half), lambda b, t: (0, 0)),
                pl.BlockSpec((cout, 1), lambda b, t: (0, 0)),
            ],
            out_specs=(
                pl.BlockSpec((1, cout, t_hw), lambda b, t: (b, 0, t)),
                pl.BlockSpec((1, 1, cout, 1), lambda b, t: (b, t, 0, 0)),
            ),
        ),
        compiler_params=pltpu.CompilerParams(
            dimension_semantics=("parallel", "parallel"),
            vmem_limit_bytes=vmem_limit),
        cost_estimate=cost1,
    )(xsp, xcp, w_sp, w_cp, bias)

    # ---- tiny squeeze-excite head in plain JAX (N x Cout scalars) ----------
    sums = jnp.sum(psums[..., 0], axis=1)                            # (N, Cout)
    if pad:
        # Zero-padded columns each contribute relu(bias) to the channel sums.
        sums = sums - float(pad) * jnp.maximum(bias[:, 0], 0.0)[None, :]
    mean = sums * (1.0 / float(HW))                                  # (N, Cout)
    a1 = jnp.maximum(mean @ params["wa1"].T.astype(jnp.float32), 0.0)   # (N, Cmid)
    atten = jax.nn.sigmoid(a1 @ params["wa2"].T.astype(jnp.float32))    # (N, Cout)
    scale = (1.0 + atten)[:, :, None].astype(jnp.float32)            # (N, Cout, 1)

    cost2 = pl.CostEstimate(
        flops=N * cout * hw_p,
        transcendentals=0,
        bytes_accessed=(N * cout * hw_p * 2 + N * cout * 4
                        + N * cout * hw_p * out_bytes),
    )

    out = pl.pallas_call(
        _ffm_apply_kernel,
        out_shape=jax.ShapeDtypeStruct((N, cout, hw_p), out_dtype),
        grid_spec=pltpu.PrefetchScalarGridSpec(
            num_scalar_prefetch=0,
            grid=(N, n_hw),
            in_specs=[
                pl.BlockSpec((1, cout, t_hw), lambda b, t: (b, 0, t)),
                pl.BlockSpec((1, cout, 1), lambda b, t: (b, 0, 0)),
            ],
            out_specs=pl.BlockSpec((1, cout, t_hw), lambda b, t: (b, 0, t)),
        ),
        compiler_params=pltpu.CompilerParams(
            dimension_semantics=("parallel", "parallel"),
            vmem_limit_bytes=vmem_limit),
        cost_estimate=cost2,
    )(feat, scale)

    if pad:
        out = out[:, :, :HW]
    return out.reshape(N, cout, H, W)


def init_params(key, in_chan, out_chan):
    """Deterministic synthetic init mirroring the module's parameter shapes.

    kaiming_normal_(a=1): gain = 1, std = 1/sqrt(fan_in), fan_in = Cin for
    the 1x1 convs.  Conv weights stored torch-style as (Cout, Cin) matrices.
    """
    k1, k2, k3, k4, k5 = jax.random.split(key, 5)
    cmid = out_chan // 4
    w1 = jax.random.normal(k1, (out_chan, in_chan), jnp.float32) / jnp.sqrt(
        float(in_chan))
    wa1 = jax.random.normal(k2, (cmid, out_chan), jnp.float32) / jnp.sqrt(
        float(out_chan))
    wa2 = jax.random.normal(k3, (out_chan, cmid), jnp.float32) / jnp.sqrt(
        float(cmid))
    gamma = 1.0 + 0.1 * jax.random.normal(k4, (out_chan,), jnp.float32)
    beta = 0.1 * jax.random.normal(k5, (out_chan,), jnp.float32)
    rmean = jnp.zeros((out_chan,), jnp.float32)
    rvar = jnp.ones((out_chan,), jnp.float32)
    return dict(w1=w1, gamma=gamma, beta=beta, rmean=rmean, rvar=rvar,
                wa1=wa1, wa2=wa2)


def _reference(fsp, fcp, params):
    """Plain-JAX reference mirroring the kernel's bf16 x / bf16 feat storage."""
    N, c_half, H, W = fsp.shape
    HW = H * W
    cout = params["w1"].shape[0]
    w_sp, w_cp, bias = _fold_bn_split(params, c_half)
    hp = jax.lax.Precision.HIGHEST
    xsp = fsp.reshape(N, c_half, HW).astype(jnp.bfloat16).astype(jnp.float32)
    xcp = fcp.reshape(N, c_half, HW).astype(jnp.bfloat16).astype(jnp.float32)
    feat = (jnp.einsum("oc,ncp->nop", w_sp.astype(jnp.float32), xsp, precision=hp)
            + jnp.einsum("oc,ncp->nop", w_cp.astype(jnp.float32), xcp, precision=hp)
            + bias[None])
    feat = jnp.maximum(feat, 0.0)                                    # (N, Cout, HW)
    mean = jnp.mean(feat, axis=2)                                    # (N, Cout)
    a1 = jnp.maximum(mean @ params["wa1"].T, 0.0)                    # (N, Cmid)
    atten = jax.nn.sigmoid(a1 @ params["wa2"].T)                     # (N, Cout)
    feat_q = feat.astype(jnp.bfloat16).astype(jnp.float32)           # bf16 feat store
    out = feat_q * (1.0 + atten)[:, :, None]
    return out.reshape(N, cout, H, W)


if __name__ == "__main__":
    # small shapes: batch=2, fsp/fcp each 8 channels -> in_chan=16, out_chan=16
    N, C_half, H, W = 2, 8, 16, 16
    in_chan, out_chan = 2 * C_half, 16

    key = jax.random.PRNGKey(0)
    k_fsp, k_fcp, k_par = jax.random.split(key, 3)
    fsp = jax.random.normal(k_fsp, (N, C_half, H, W), jnp.float32)
    fcp = jax.random.normal(k_fcp, (N, C_half, H, W), jnp.float32)
    params = init_params(k_par, in_chan, out_chan)

    # hw_tile=128 forces the multi-tile per-tile-GAP path even at this small
    # test resolution (HW=256 -> 2 spatial tiles per batch element).
    out = jax.block_until_ready(
        feature_fusion_module(fsp, fcp, params, hw_tile=128))
    ref = _reference(fsp, fcp, params)
    assert out.shape == (N, out_chan, H, W)
    # bf16 feat storage => up to ~2^-7 relative difference vs the reference.
    assert jnp.allclose(out, ref, atol=2e-3, rtol=2e-2), float(
        jnp.max(jnp.abs(out - ref)))

    # Second check: non-128-divisible spatial size exercises the padding and
    # the GAP pad-correction path (HW=100 -> padded to 128), auto tiling.
    H2 = W2 = 10
    fsp2 = jax.random.normal(k_fsp, (N, C_half, H2, W2), jnp.float32)
    fcp2 = jax.random.normal(k_fcp, (N, C_half, H2, W2), jnp.float32)
    out2 = jax.block_until_ready(feature_fusion_module(fsp2, fcp2, params))
    ref2 = _reference(fsp2, fcp2, params)
    assert out2.shape == (N, out_chan, H2, W2)
    assert jnp.allclose(out2, ref2, atol=2e-3, rtol=2e-2), float(
        jnp.max(jnp.abs(out2 - ref2)))

    print("KERNEL_OK")
</pallas_src>

<mosaic_0001>
module attributes {stable_mosaic.version = 11 : i64} {
  func.func @_ffm_feat_kernel(%arg0: i32, %arg1: i32, %arg2: memref<1x8x128xf32, #tpu.memory_space<vmem>>, %arg3: memref<1x8x128xf32, #tpu.memory_space<vmem>>, %arg4: memref<16x8xbf16, #tpu.memory_space<vmem>>, %arg5: memref<16x8xbf16, #tpu.memory_space<vmem>>, %arg6: memref<16x1xf32, #tpu.memory_space<vmem>>, %arg7: memref<1x16x128xbf16, #tpu.memory_space<vmem>>, %arg8: memref<1x1x16x1xf32, #tpu.memory_space<vmem>>) attributes {dimension_semantics = [#tpu.dimension_semantics<parallel>, #tpu.dimension_semantics<parallel>], iteration_bounds = array<i64: 2, 2>, scalar_prefetch = 0 : i64, scratch_operands = 0 : i64, tpu.core_type = #tpu.core_type<tc>, window_params = [{transform_indices = @transform_0, window_bounds = array<i64: 1, 8, 128>}, {transform_indices = @transform_1, window_bounds = array<i64: 1, 8, 128>}, {pipeline_mode = #tpu.pipeline_mode<synchronous>, transform_indices = @transform_2, window_bounds = array<i64: 16, 8>}, {pipeline_mode = #tpu.pipeline_mode<synchronous>, transform_indices = @transform_3, window_bounds = array<i64: 16, 8>}, {pipeline_mode = #tpu.pipeline_mode<synchronous>, transform_indices = @transform_4, window_bounds = array<i64: 16, 1>}, {transform_indices = @transform_5, window_bounds = array<i64: 1, 16, 128>}, {transform_indices = @transform_6, window_bounds = array<i64: 1, 1, 16, 1>}]} {
    %c0 = arith.constant 0 : index
    %c0_0 = arith.constant 0 : index
    %c0_1 = arith.constant 0 : index
    %0 = vector.load %arg2[%c0, %c0_0, %c0_1] : memref<1x8x128xf32, #tpu.memory_space<vmem>>, vector<1x8x128xf32>
    %1 = vector.shape_cast %0 : vector<1x8x128xf32> to vector<8x128xf32>
    %2 = arith.truncf %1 : vector<8x128xf32> to vector<8x128xbf16>
    %c0_2 = arith.constant 0 : index
    %c0_3 = arith.constant 0 : index
    %c0_4 = arith.constant 0 : index
    %3 = vector.load %arg3[%c0_2, %c0_3, %c0_4] : memref<1x8x128xf32, #tpu.memory_space<vmem>>, vector<1x8x128xf32>
    %4 = vector.shape_cast %3 : vector<1x8x128xf32> to vector<8x128xf32>
    %5 = arith.truncf %4 : vector<8x128xf32> to vector<8x128xbf16>
    %c0_5 = arith.constant 0 : index
    %c0_6 = arith.constant 0 : index
    %6 = vector.load %arg4[%c0_5, %c0_6] : memref<16x8xbf16, #tpu.memory_space<vmem>>, vector<16x8xbf16>
    %cst = arith.constant dense<0.000000e+00> : vector<16x128xf32>
    %7 = tpu.matmul %6, %2, %cst {dimension_numbers = #tpu.dot_dimension_numbers<[1], [0], [0], [1], [0, 0, 1, 1], [], []>} : vector<16x8xbf16>, vector<8x128xbf16>, vector<16x128xf32> -> vector<16x128xf32>
    %c0_7 = arith.constant 0 : index
    %c0_8 = arith.constant 0 : index
    %8 = vector.load %arg5[%c0_7, %c0_8] : memref<16x8xbf16, #tpu.memory_space<vmem>>, vector<16x8xbf16>
    %cst_9 = arith.constant dense<0.000000e+00> : vector<16x128xf32>
    %9 = tpu.matmul %8, %5, %cst_9 {dimension_numbers = #tpu.dot_dimension_numbers<[1], [0], [0], [1], [0, 0, 1, 1], [], []>} : vector<16x8xbf16>, vector<8x128xbf16>, vector<16x128xf32> -> vector<16x128xf32>
    %10 = arith.addf %7, %9 : vector<16x128xf32>
    %c0_10 = arith.constant 0 : index
    %c0_11 = arith.constant 0 : index
    %11 = vector.load %arg6[%c0_10, %c0_11] : memref<16x1xf32, #tpu.memory_space<vmem>>, vector<16x1xf32>
    %12 = vector.broadcast %11 : vector<16x1xf32> to vector<16x128xf32>
    %13 = arith.addf %10, %12 : vector<16x128xf32>
    %cst_12 = arith.constant 0.000000e+00 : f32
    %14 = vector.broadcast %cst_12 : f32 to vector<16x128xf32>
    %15 = arith.maximumf %13, %14 : vector<16x128xf32>
    %16 = arith.truncf %15 : vector<16x128xf32> to vector<16x128xbf16>
    %c0_13 = arith.constant 0 : index
    %c0_14 = arith.constant 0 : index
    %c0_15 = arith.constant 0 : index
    %17 = vector.load %arg7[%c0_13, %c0_14, %c0_15] : memref<1x16x128xbf16, #tpu.memory_space<vmem>>, vector<1x16x128xbf16>
    %18 = vector.shape_cast %17 : vector<1x16x128xbf16> to vector<16x128xbf16>
    %19 = vector.shape_cast %16 : vector<16x128xbf16> to vector<1x16x128xbf16>
    tpu.vector_store %arg7[%c0_13, %c0_14, %c0_15], %19 {strides = array<i32>} : memref<1x16x128xbf16, #tpu.memory_space<vmem>>, vector<1x16x128xbf16>,
    %cst_16 = arith.constant dense<0.000000e+00> : vector<16xf32>
    %20 = vector.multi_reduction <add>, %15, %cst_16 [1] : vector<16x128xf32> to vector<16xf32>
    %21 = vector.shape_cast %20 : vector<16xf32> to vector<16x1xf32>
    %c0_17 = arith.constant 0 : index
    %c0_18 = arith.constant 0 : index
    %c0_19 = arith.constant 0 : index
    %c0_20 = arith.constant 0 : index
    %22 = vector.load %arg8[%c0_17, %c0_18, %c0_19, %c0_20] : memref<1x1x16x1xf32, #tpu.memory_space<vmem>>, vector<1x1x16x1xf32>
    %23 = vector.shape_cast %22 : vector<1x1x16x1xf32> to vector<16x1xf32>
    %24 = vector.shape_cast %21 : vector<16x1xf32> to vector<1x1x16x1xf32>
    tpu.vector_store %arg8[%c0_17, %c0_18, %c0_19, %c0_20], %24 {strides = array<i32>} : memref<1x1x16x1xf32, #tpu.memory_space<vmem>>, vector<1x1x16x1xf32>,
    return
  }
  func.func @transform_0(%arg0: i32, %arg1: i32) -> (i32, i32, i32) {
    %c0_i32 = arith.constant 0 : i32
    %c0_i32_0 = arith.constant 0 : i32
    return %arg0, %c0_i32, %arg1 : i32, i32, i32
  }
  func.func @transform_1(%arg0: i32, %arg1: i32) -> (i32, i32, i32) {
    %c0_i32 = arith.constant 0 : i32
    %c0_i32_0 = arith.constant 0 : i32
    return %arg0, %c0_i32, %arg1 : i32, i32, i32
  }
  func.func @transform_2(%arg0: i32, %arg1: i32) -> (i32, i32) {
    %c0_i32 = arith.constant 0 : i32
    %c0_i32_0 = arith.constant 0 : i32
    %c0_i32_1 = arith.constant 0 : i32
    return %c0_i32, %c0_i32_0 : i32, i32
  }
  func.func @transform_3(%arg0: i32, %arg1: i32) -> (i32, i32) {
    %c0_i32 = arith.constant 0 : i32
    %c0_i32_0 = arith.constant 0 : i32
    %c0_i32_1 = arith.constant 0 : i32
    return %c0_i32, %c0_i32_0 : i32, i32
  }
  func.func @transform_4(%arg0: i32, %arg1: i32) -> (i32, i32) {
    %c0_i32 = arith.constant 0 : i32
    %c0_i32_0 = arith.constant 0 : i32
    %c0_i32_1 = arith.constant 0 : i32
    return %c0_i32, %c0_i32_0 : i32, i32
  }
  func.func @transform_5(%arg0: i32, %arg1: i32) -> (i32, i32, i32) {
    %c0_i32 = arith.constant 0 : i32
    %c0_i32_0 = arith.constant 0 : i32
    return %arg0, %c0_i32, %arg1 : i32, i32, i32
  }
  func.func @transform_6(%arg0: i32, %arg1: i32) -> (i32, i32, i32, i32) {
    %c0_i32 = arith.constant 0 : i32
    %c0_i32_0 = arith.constant 0 : i32
    %c0_i32_1 = arith.constant 0 : i32
    return %arg0, %arg1, %c0_i32, %c0_i32_0 : i32, i32, i32, i32
  }
}

</mosaic_0001>

<bundles_post_ra>
// kernel: tpu_custom_call.1
= control target key start
LH: loop header
LB: loop body
LE: loop exit
PB: predicated region body
PF: predicated region fallthrough
CT: control target
= control target key end

     0   :  { %s1200_s0 = inlined_call_operand.vmem [shape: f32[2,8,256], index: 0, kind: input, shape index: {}]   ;;  %s1201_s1 = inlined_call_operand.hbm [shape: f32[2,8,256], index: 1, kind: input, shape index: {}]   ;;  %s1202_s2 = inlined_call_operand.vmem [shape: bf16[16,8], index: 2, kind: input, shape index: {}]   ;;  %s1203_s3 = inlined_call_operand.vmem [shape: bf16[16,8], index: 3, kind: input, shape index: {}]   ;;  %s1204_s4 = inlined_call_operand.vmem [shape: f32[16,1], index: 4, kind: input, shape index: {}]   ;;  %s1205_s5 = inlined_call_operand.hbm [shape: bf16[2,16,256], index: 5, kind: output, shape index: {0}]   ;;  %s1206_s6 = inlined_call_operand.vmem [shape: f32[2,2,16,1], index: 6, kind: output, shape index: {1}]  }
   0x1   :  { %1212 = sst [smem:[#allocation11_spill]] %s1200_s0 }
   0x2   :  { %12 = vsyncpa [#allocation3], 0 }
   0x3   :  { %14 = vsyncpa [#allocation3 + $0x1], 0 }
   0x4   :  { %15 = vsyncpa [#allocation4], 0 }
   0x5   :  { %17 = vsyncpa [#allocation4 + $0x1], 0  ;;  %s970_s21 = smov 0   ;;  %s972_s22 = smov 0  }
   0x6   :  { %s974_s23 = smov 0   ;;  %s976_s24 = smov 0  }
   0x7   :  { %s978_s25 = smov 0   ;;  %s980_s26 = smov 0  }
   0x8   :  { %s982_s27 = smov 0   ;;  %s984_s28 = smov 0  }
   0x9 LB: > { %1213 = sst [smem:[#allocation8_spill]] %s897_s21  ;;  %s661_s29 = sadd.s32 4294967295, %s925_s28   ;;  %s925_s28 = sphi %s984_s28, %s23_s28   ;;  %s921_s27 = sphi %s982_s27, %s1236_s27   ;;  %s917_s26 = sphi %s980_s26, %s1235_s26   ;;  %s913_s25 = sphi %s978_s25, %s1234_s25   ;;  %s909_s24 = sphi %s976_s24, %s1233_s24   ;;  %s905_s23 = sphi %s974_s23, %s1232_s23   ;;  %s901_s22 = sphi %s972_s22, %s1231_s22   ;;  %s897_s21 = sphi %s970_s21, %s1230_s21  }
   0xa   : > { %s662_s30 = sadd.s32 4294967294, %s925_s28   ;;  %s32_s7 = sadd.s32 1, %s917_s26 }
   0xb   : > { %s35_s8 = sadd.s32 1, %s921_s27  ;;  %p33_p0 = scmp.ge.s32.totalorder %s32_s7, 2 }
   0xc   : > { %s72_s9 = sadd.s32 1, %s905_s23  ;;  %p79_p1 = scmp.ne.s32.totalorder %s905_s23, %s901_s22 }
   0xd   : > { %p80_p2 = scmp.eq.s32.totalorder %s925_s28, 0  ;;  %s1238_s7 = smov (%p33_p0, %s32_s7), 0 }
   0xe   : > { %1214 = sst [smem:[#allocation9_spill]] %s1238_s7  ;;  %s1240_s8 = smov (!%p33_p0, %s35_s8), %s921_s27 }
   0xf   : > { %s68_s10 = ssub.s32 %s917_s26, %s1238_s7  ;;  %p1023_p3 = por %p80_p2, %p79_p1 }
  0x10   : > { %p37_p4 = scmp.ge.s32.totalorder %s1240_s8, 2  ;;  %p85_p5 = scmp.ne.s32.totalorder %s901_s22, %s897_s21 }
  0x11   : > { %p86_p6 = scmp.eq.s32.totalorder %s661_s29, 0  ;;  %p174_p7 = scmp.eq.s32.totalorder %s661_s29, 3 }
  0x12   : > { %s1242_s8 = smov (%p37_p4, %s1240_s8), 0  ;;  %p180_p10 = scmp.eq.s32.totalorder %s662_s30, 3 }
  0x13   : > { %1216 = sst [smem:[#allocation10_spill]] %s1242_s8  ;;  %p1031_p8 = por %p86_p6, %p85_p5 }
  0x14   : > { %p1035_p9 = por %p174_p7, %p79_p1  ;;  %s67_s14 = ssub.s32 %s921_s27, %s1242_s8 }
  0x15   : > { %s69_s15 = sor.u32 %s68_s10, %s67_s14  ;;  %p1041_p12 = por %p180_p10, %p85_p5 }
  0x16   : > { %s1218_s13 = scalar_select %p1035_p9, 1, 0 }
  0x17   : > { %p70_p11 = scmp.eq.s32.totalorder %s69_s15, 0  ;;  %p722_p13 = scmp.lt.s32.totalorder %s925_s28, 4 }
  0x18   : > { %s1219_s16 = scalar_select %p1041_p12, 1, 0 }
  0x19   : > { %s248_s17 = sand.u32 1, %s905_s23   ;;  %s666_s20 = sshll.u32 %s921_s27, 1 }
  0x1a   : > { %s1048_s18 = scalar_select %p70_p11, %s905_s23, %s72_s9  }
  0x1b   : > { %s665_s19 = sshll.u32 %s248_s17, 3  ;;  %s257_s29 = sadd.s32 %s917_s26, %s666_s20 }
  0x1c   : > { %s252_s7 = scalar_lea.vmem [#allocation2], %s665_s19  ;;  %s667_s8 = sshll.u32 %s257_s29, 7 }
  0x1d   : > { %s261_s21 = sshll.u32 %s252_s7, 4  ;;  %s1057_s14 = scalar_lea.hbm %s1201_s1, %s667_s8  ;;  %s1052_s21 = int_to_ptr.vmem [resolvable:$true] %s261_s21 }
  0x1e   : > { %p1061_p0 = pnand %p722_p13, %p1023_p3  ;;  %s249_s7 = scalar_lea.sflag [#allocation3], %s248_s17 }
  0x1f   : > { %s797_s15 = scalar_lea.hbm %s1057_s14, 128  ;;  %s802_s19 = scalar_lea.hbm %s1201_s1, 512 }
  0x20   : > { %p798_p4 = scmp.ne.s32.totalorder %s1057_s14, %s797_s15  ;;  %p799_p5 = pneg %p1061_p0 }
  0x21   : > { %p803_p3 = scmp.lt.u32.totalorder %s1057_s14, %s1201_s1  ;;  %p804_p10 = scmp.lt.u32.totalorder %s802_s19, %s797_s15 }
  0x22   : > { %p800_p6 = pnand %p799_p5, %p798_p4  ;;  %p806_p13 = scmp.lt.u32.totalorder %s797_s15, %s1057_s14 }
  0x23   : > { %p805_p11 = por %p804_p10, %p803_p3 }
  0x24   : > { %p801_p7 = pneg %p800_p6 }
  0x25   : > { %p807_p1 = por %p806_p13, %p805_p11 }
  0x27   : > { %p808_p2 = pnand %p807_p1, %p801_p7 }
  0x29   : > { %811 = shalt.err (!%p808_p2)
}
  0x2a   : > { %s812_s17 = scalar_lea.vmem %s1052_s21, 128  ;;  %s927_s30 = smov [#allocation2]  }
  0x2b   : > { %p813_p4 = scmp.ne.s32.totalorder %s1052_s21, %s812_s17  ;;  %s817_s10 = sshll.u32 %s927_s30, 4  ;;  %s818_s10 = int_to_ptr.vmem [resolvable:$false] %s817_s10 }
  0x2c   : > { %s819_s8 = scalar_lea.vmem %s818_s10, 256  ;;  %p820_p9 = scmp.lt.s32.totalorder %s1052_s21, %s818_s10 }
  0x2d   : > { %p815_p6 = pnand %p813_p4, %p799_p5  ;;  %p821_p3 = scmp.lt.s32.totalorder %s819_s8, %s812_s17 }
  0x2f   : > { %p816_p12 = pneg %p815_p6  ;;  %p822_p10 = por %p821_p3, %p820_p9 }
  0x31   : > { %p823_p11 = pnand %p822_p10, %p816_p12 }
  0x33   : > { %826 = shalt.err (!%p823_p11)
}
  0x34   : > { %717 = dma.hbm_to_vmem [thread:$0]  (!%p1061_p0), %s1057_s14, 128, %s1052_s21, %s249_s7  }
  0x35   : > { %p1221_p1 = scmp.lt.s32.totalorder %s925_s28, 5  ;;  %p1222_p2 = scmp.ge.s32.totalorder %s925_s28, 1 }
  0x37   : > { %p267_p5 = pnand %p1222_p2, %p1221_p1 }
  0x38   : > { %s1097_s15 = sand.u32 (!%p267_p5), 1, %s901_s22  }
  0x39   : > { %270 = sbr.rel (%p267_p5) target bundleno = 445 (0x1bd), region = 40  ;;  %s1211_s11 = sshll.u32 (!%p267_p5), %s1097_s15, 3 }
  0x3a   : > { %s273_s19 = scalar_lea.sflag (!%p267_p5), [#allocation3], %s1097_s15  ;;  %s276_s9 = scalar_lea.vmem (!%p267_p5), [#allocation2], %s1211_s11 }
  0x40   : > { %888 = dma.done.wait (%p1031_p8), %s273_s19, 128  }
  0x41   : > { %890 = vsyncadd (%p1031_p8), %s273_s19, 4294967168  ;;  %p322_p9 = scmp.lt.s32.totalorder %s913_s25, 1  ;;  %p324_p12 = scmp.lt.s32.totalorder %s909_s24, 1  ;;  %v928_v0 = vmov 0.0   ;;  %vm929_vm0 = vmmov 0   ;;  %v930_v1 = vmov 0  }
  0x42   : > { %698 = vmatprep.subr.bf16.mxu0 %v928_v0  ;;  %704 = vmatprep.subr.bf16.mxu1 %v928_v0  ;;  %v342_v2 = vld [vmem:[%s276_s9] sm:$0xff]  ;;  %vm357_vm1 = vcmask 1043456   ;;  %s1223_s0 = sld [smem:[#allocation11_spill]]  ;;  %vm353_vm2 = vcmask 64512   ;;  %s1224_s11 = sshll.u32 %s1097_s15, 3 }
  0x43   : > { %s1110_s21 = scalar_select %p322_p9, %s913_s25, 1  ;;  %700 = vmatprep.mubr.msk.bf16.mxu0 %vm929_vm0, %v928_v0  ;;  %706 = vmatprep.mubr.msk.bf16.mxu1 %vm929_vm0, %v928_v0  ;;  %v343_v3 = vpack.c.bf16 %v342_v2, %v342_v2  ;;  %v454_v6 = vld [vmem:[%s1204_s4] sm:$0xff]  ;;  %v455_v11 = vld [vmem:[%s1204_s4 + $0x8] sm:$0xff] }
  0x44   : > { %s1113_s14 = scalar_select %p324_p12, %s909_s24, 1  ;;  %794 = vset.pattern.permute.xlu0 %v930_v1  ;;  %v795_v8 = vld [vmem:[%s1203_s3] sm:$0xff]  }
  0x45   : > { %s671_s12 = sshll.u32 %s1110_s21, 1  ;;  %v359_v7 = vsel %vm357_vm1, %v343_v3, 0  ;;  %458 = vperm.xlu0 %794, %v454_v6   ;;  %v796_v10 = vld [vmem:[%s1202_s2] sm:$0xff]   ;;  %s310_s29 = scalar_lea.vmem [#allocation5], %s1224_s11 }
  0x46   : > { %s327_s7 = sadd.s32 %s671_s12, %s1113_s14  ;;  %699 = vmatpush3.bf16.msra.mxu0 %v359_v7  ;;  %s511_s17 = sshll.u32 %s310_s29, 4  ;;  %s1136_s17 = int_to_ptr.vmem [resolvable:$true] %s511_s17 }
  0x47   : > { %s672_s20 = sshll.u32 %s327_s7, 3  ;;  %s488_s7 = scalar_lea.sflag [#allocation4], %s1097_s15 }
  0x48   : > { %s329_s30 = scalar_lea.vmem %s1223_s0, %s672_s20  ;;  %s827_s20 = scalar_lea.vmem %s1136_s17, 128 }
  0x49   : > { %v340_v4 = vld [vmem:[%s329_s30] sm:$0xff]  ;;  %701 = vmatmul.mubr.msk.bf16.vlgmr.msra.gmra.mrb[0].mxu0 %vm353_vm2, %v795_v8  ;;  %463 = vperm.xlu0 %794, %v455_v11   ;;  %s683_s30 = sshll.u32 %s913_s25, 2  ;;  %p828_p8 = scmp.ne.s32.totalorder %s1136_s17, %s827_s20 }
  0x4a   : > { %v341_v5 = vpack.c.bf16 %v340_v4, %v340_v4  ;;  %s508_s10 = sadd.s32 %s909_s24, %s683_s30  ;;  %p1225_p0 = scmp.ne.s32.totalorder %s1218_s13, 0 }
  0x4b   : > { %s684_s8 = sshll.u32 %s508_s10, 6  ;;  %s931_s11 = smov [#allocation5]  }
  0x4c   : > { %v411_v9 = vsel %vm357_vm1, %v341_v5, 0  ;;  %s1141_s12 = scalar_lea.hbm %s1205_s5, %s684_s8  ;;  %p829_p7 = pnand %p828_p8, %p1225_p0 }
  0x4d   : > { %705 = vmatpush3.bf16.msra.mxu1 %v411_v9  ;;  %s831_s25 = sshll.u32 %s931_s11, 4  ;;  %s832_s25 = int_to_ptr.vmem [resolvable:$false] %s831_s25 }
  0x4e   : > { %p830_p13 = pneg %p829_p7  ;;  %s833_s24 = scalar_lea.vmem %s832_s25, 256 }
  0x4f   : > { %p834_p4 = scmp.lt.s32.totalorder %s1136_s17, %s832_s25  ;;  %p835_p6 = scmp.lt.s32.totalorder %s833_s24, %s827_s20 }
  0x50   : > { %707 = vmatmul.mubr.msk.bf16.vlgmr.msra.gmra.mrb[0].mxu1 %vm353_vm2, %v796_v10 }
  0x51   : > { %p836_p3 = por %p835_p6, %p834_p4 }
  0x53   : > { %p837_p10 = pnand %p836_p3, %p830_p13 }
  0xc4   : > { %v459_v12 = vpop.permute.xlu0 %458 }
  0xc8   : > { %v464_v24 = vpop.permute.xlu0 %463 }
 0x11c   : > { %v395_v13 = vpop.f32.mrb[0].mxu0 }
 0x11d   : > { %v702_v14 = vpop.f32.mrb[1].mxu0 }
 0x11e   : > { %v398_v17 = vpop.f32.mrb[2].mxu0 }
 0x11f   : > { %v703_v19 = vpop.f32.mrb[3].mxu0 }
 0x123   : > { %v447_v15 = vpop.f32.mrb[0].mxu1 }
 0x124   : > { %v448_v16 = vadd.f32 %v447_v15, %v395_v13  ;;  %v708_v18 = vpop.f32.mrb[1].mxu1 }
 0x125   : > { %v450_v20 = vpop.f32.mrb[2].mxu1 }
 0x126   : > { %v451_v21 = vadd.f32 %v450_v20, %v398_v17  ;;  %v709_v22 = vpop.f32.mrb[3].mxu1  ;;  %v466_v23 = vadd.f32 %v459_v12, %v448_v16 }
 0x128   : > { %v468_v25 = vmax.f32 %v466_v23, 0.0  ;;  %v467_v26 = vadd.f32 %v464_v24, %v451_v21 }
 0x12a   : > { %480 = vadd.xlane.f32.xlu1 %v468_v25  ;;  %v469_v27 = vmax.f32 %v467_v26, 0.0 }
 0x12c   : > { %v692_v28 = vpack.c.bf16 %v469_v27, %v468_v25 }
 0x12e   : > { %482 = vadd.xlane.f32.xlu1 %v469_v27  ;;  %693 = vst [vmem:[%s310_s29] sm:$0xff] %v692_v28  }
 0x12f   : > { %840 = shalt.err (!%p837_p10)
}
 0x130   : > { %s841_s29 = scalar_lea.hbm %s1141_s12, 128  ;;  %s845_s8 = scalar_lea.hbm %s1205_s5, 512 }
 0x131   : > { %p842_p11 = scmp.ne.s32.totalorder %s1141_s12, %s841_s29  ;;  %p846_p5 = scmp.lt.u32.totalorder %s1141_s12, %s1205_s5 }
 0x132   : > { %p847_p9 = scmp.lt.u32.totalorder %s845_s8, %s841_s29  ;;  %p849_p8 = scmp.lt.u32.totalorder %s841_s29, %s1141_s12 }
 0x133   : > { %p843_p1 = pnand %p842_p11, %p1225_p0 }
 0x134   : > { %p848_p12 = por %p847_p9, %p846_p5 }
 0x135   : > { %p844_p2 = pneg %p843_p1 }
 0x136   : > { %p850_p7 = por %p849_p8, %p848_p12 }
 0x138   : > { %p851_p13 = pnand %p850_p7, %p844_p2 }
 0x13a   : > { %854 = shalt.err (!%p851_p13)
}
 0x13b   : > { %s932_s20 = smov 64   ;;  %s933_s11 = smov 128   ;;  %vm484_vm3 = vcmask 7168  }
 0x13c   : > { %s934_s25 = smov 4   ;;  %s673_s24 = sshll.u32 %s1113_s14, 1 }
 0x13d   : > { %712 = dma.vmem_to_hbm [thread:$0]  (%p1225_p0), %s1136_s17, 128, %s1141_s12, %s488_s7, %s932_s20, %s933_s11, %s934_s25  }
 0x13e   : > { %s674_s30 = sshll.u32 %s1110_s21, 2 }
 0x13f   : > { %s336_s10 = sadd.s32 %s674_s30, %s673_s24 }
 0x140   : > { %s675_s8 = sshll.u32 %s336_s10, 3 }
 0x141   : > { %s338_s9 = scalar_lea.vmem %s1206_s6, %s675_s8 }
 0x1b7   : > { %v481_v29 = vpop.xlane.xlu1 %480 }
 0x1b8   : > { %485 = vst.msk [vmem:[%s338_s9] sm:$0xff] %vm484_vm3, %v481_v29 }
 0x1bb   : > { %v483_v30 = vpop.xlane.xlu1 %482 }
 0x1bc   : > { %486 = vst.msk [vmem:[%s338_s9 + $0x8] sm:$0xff] %vm484_vm3, %v483_v30 }
 0x1bd PF: > { %s1226_s0 = sld [smem:[#allocation8_spill]]  ;;  %p723_p4 = scmp.ge.s32.totalorder %s925_s28, 2 }
 0x1be   : > { %p1227_p0 = scmp.ne.s32.totalorder %s1219_s16, 0 }
 0x1c0   : > { %p719_p6 = pnand %p723_p4, %p1227_p0 }
 0x1c3   : > { %s529_s13 = sand.u32 1, %s1226_s0  }
 0x1c4   : > { %s530_s15 = scalar_lea.sflag [#allocation4], %s529_s13 }
 0x1c5   : > { %892 = dma.done.wait (!%p719_p6), %s530_s15, 128  }
 0x1c6   : > { %894 = vsyncadd (!%p719_p6), %s530_s15, 4294967168  ;;  %s23_s28 = sadd.s32 1, %s925_s28   ;;  %s1228_s14 = sld [smem:[#allocation9_spill]] }
 0x1c7   : > { %p20_p3 = scmp.ge.s32.totalorder %s23_s28, 6   ;;  %s1229_s17 = sld [smem:[#allocation10_spill]] }
 0x1c8   : > { %s1230_s21 = smov %s901_s22  ;;  %s1231_s22 = smov %s905_s23 }
 0x1c9   : > { %s1232_s23 = smov %s1048_s18  ;;  %s1233_s24 = smov %s917_s26 }
 0x1ca   : > { %s1234_s25 = smov %s921_s27  ;;  %22 = sbr.rel (!%p20_p3) target bundleno = 9 (0x9), region = 100 }
 0x1cc   : > { %s1235_s26 = smov %s1228_s14 }
 0x1cd   : > { %s1236_s27 = smov %s1229_s17 }
 0x1d1   :  { %547 = vsyncpa [#allocation3], 1 }
 0x1d2   :  { %549 = vsyncpa [#allocation3 + $0x1], 1 }
 0x1d3   :  { %550 = vsyncpa [#allocation4], 1 }
 0x1d4   :  { %552 = vsyncpa [#allocation4 + $0x1], 1 }

</bundles_post_ra>
